<compile_context>
chip_gen: v7x
topology: tpu7x:2x2x1
jax: 0.10.0
libtpu: 0.0.40
codegen_flags: <defaults>
</compile_context>

<pallas_src>
import functools

import jax
import jax.numpy as jnp
from jax.experimental import pallas as pl
from jax.experimental.pallas import tpu as pltpu


def _round_up(x, m):
    return (x + m - 1) // m * m


@functools.lru_cache(maxsize=None)
def _vmem_cap_bytes():
    """Physical per-core VMEM; conservative v7x default if the query fails."""
    if hasattr(pltpu, "get_tpu_info"):
        try:
            cap = int(pltpu.get_tpu_info().vmem_capacity_bytes)
            if cap > 0:
                return cap
        except Exception:  # info query only -- never changes the kernel build
            pass
    return 64 * 1024 * 1024  # v7x per-TensorCore VMEM (smallest of the three)


@functools.lru_cache(maxsize=None)
def _supports_buffered():
    """Explicit feature probe: can BlockSpec(pipeline_mode=pl.Buffered(1)) lower?

    Dedicated tiny probe compile, NOT a fallback around the real kernel build,
    so genuine kernel errors (VMEM OOM, shape bugs) are never masked.
    """
    if not hasattr(pl, "Buffered"):
        return False

    def _copy(x_ref, o_ref):
        o_ref[...] = x_ref[...]

    try:
        probe = pl.pallas_call(
            _copy,
            out_shape=jax.ShapeDtypeStruct((8, 128), jnp.float32),
            grid=(1,),
            in_specs=[pl.BlockSpec((8, 128), lambda i: (0, 0),
                                   pipeline_mode=pl.Buffered(1))],
            out_specs=pl.BlockSpec((8, 128), lambda i: (0, 0)),
        )
        jax.block_until_ready(probe(jnp.zeros((8, 128), jnp.float32)))
        return True
    except Exception:  # probe only: "feature absent" is the only conclusion drawn
        return False


# --------------------------------------------------------------------------
# Parameter preparation (hoisted out of the per-call path).
# --------------------------------------------------------------------------
def prepare_mlp_params(w1, b1, w2, b2, *, compute_dtype=jnp.bfloat16):
    """One-time prep: transpose + cast + lane-dense zero-pad of the weights.

    PyTorch nn.Linear layout: w1 [out_d, in_d], b1 [out_d],
    w2 [out_d, out_d], b2 [out_d].  Call once, reuse across many forwards.
    Use compute_dtype=jnp.float32 for bit-closer parity with a f32 MLP.
    """
    out_d, in_d = w1.shape
    assert w2.shape == (out_d, out_d)
    cdt = jnp.dtype(compute_dtype)
    in_p = _round_up(in_d, 128)
    out_p = _round_up(out_d, 128)
    w1_p = jnp.zeros((in_p, out_p), cdt).at[:in_d, :out_d].set(w1.T.astype(cdt))
    w2_p = jnp.zeros((out_p, out_p), cdt).at[:out_d, :out_d].set(w2.T.astype(cdt))
    b1_p = jnp.zeros((1, out_p), jnp.float32).at[0, :out_d].set(
        b1.astype(jnp.float32))
    b2_p = jnp.zeros((1, out_p), jnp.float32).at[0, :out_d].set(
        b2.astype(jnp.float32))
    return dict(w1=w1_p, b1=b1_p, w2=w2_p, b2=b2_p,
                in_d=in_d, out_d=out_d, in_p=in_p, out_p=out_p,
                compute_dtype=cdt)


# --------------------------------------------------------------------------
# Kernels
# --------------------------------------------------------------------------
def _mlp_kernel_resident(x_ref, w1_ref, b1_ref, w2_ref, b2_ref, o_ref):
    # Whole-resident W1/W2; grid = (batch tiles,)  [parallel].
    x = x_ref[...]
    if x.dtype != w1_ref.dtype:          # in-kernel cast: VPU filler, saves HBM
        x = x.astype(w1_ref.dtype)
    h = jnp.dot(x, w1_ref[...], preferred_element_type=jnp.float32)
    h = jnp.maximum(h + b1_ref[...], 0.0)          # bias + ReLU in f32
    h = h.astype(w2_ref.dtype)
    y = jnp.dot(h, w2_ref[...], preferred_element_type=jnp.float32)
    o_ref[...] = (y + b2_ref[...]).astype(o_ref.dtype)


def _mlp_kernel_tiled(x_ref, w1_ref, b1_ref, w2_ref, b2_ref, o_ref, h_ref):
    # grid = (batch tile i [parallel], out_p column tile j [arbitrary]).
    # Layer-1 hidden is computed once per batch tile and kept in VMEM scratch.
    @pl.when(pl.program_id(1) == 0)
    def _():
        x = x_ref[...]
        if x.dtype != w1_ref.dtype:
            x = x.astype(w1_ref.dtype)
        h = jnp.dot(x, w1_ref[...], preferred_element_type=jnp.float32)
        h_ref[...] = jnp.maximum(h + b1_ref[...], 0.0).astype(h_ref.dtype)

    y = jnp.dot(h_ref[...], w2_ref[...], preferred_element_type=jnp.float32)
    o_ref[...] = (y + b2_ref[...]).astype(o_ref.dtype)


# --------------------------------------------------------------------------
# Forward wrapper
# --------------------------------------------------------------------------
def mlp_forward(x, params, *, tb=512, out_dtype=None):
    """Fused y = relu(x @ w1.T + b1) @ w2.T + b2 using prepared params."""
    if not isinstance(params, dict):
        params = prepare_mlp_params(*params)

    N, in_d = x.shape
    assert in_d == params["in_d"]
    in_p, out_p, out_d = params["in_p"], params["out_p"], params["out_d"]
    cdt = params["compute_dtype"]
    w1_p, b1_p, w2_p, b2_p = params["w1"], params["b1"], params["w2"], params["b2"]
    out_dtype = jnp.dtype(out_dtype) if out_dtype is not None else x.dtype

    cd = cdt.itemsize
    o_bytes = jnp.dtype(out_dtype).itemsize
    x_bytes = jnp.dtype(x.dtype).itemsize if in_d == in_p else cd

    cap = _vmem_cap_bytes()
    budget = int(0.85 * cap)  # ~108 MiB on v5e/v6e (128 MiB), ~54 MiB on v7x (64)

    use_buffered = _supports_buffered()
    w_copies = 1 if use_buffered else 2   # single-buffer constant-index weights
    x_bufs = 3 if (use_buffered and in_p <= 256 and out_p <= 256) else 2

    # --- batch tiling: minimize padding waste, keep >=2 steps for v7x megacore
    n16 = _round_up(N, 16)
    tb_target = max(16, min(_round_up(tb, 16), n16))
    num_tiles = pl.cdiv(n16, tb_target)
    if num_tiles == 1 and n16 > 256:
        num_tiles = 2                     # shard the batch across v7x's 2 TCs
    tb_eff = _round_up(pl.cdiv(n16, num_tiles), 16)

    def resident_vmem(tbe):
        weights = w_copies * ((in_p * out_p + out_p * out_p) * cd + 2 * out_p * 4)
        tiles = x_bufs * tbe * in_p * x_bytes + 2 * tbe * out_p * o_bytes
        interm = tbe * out_p * (4 + 4 + cd)   # h f32, y f32, h in compute dtype
        return weights + tiles + interm

    def tiled_vmem(tbe, tn):
        w1b = w_copies * (in_p * out_p * cd + out_p * 4)
        w2b = 2 * (out_p * tn * cd + tn * 4)  # W2/b2 column tiles (double-buffered)
        tiles = 2 * tbe * in_p * x_bytes + 2 * tbe * tn * o_bytes
        hscr = tbe * out_p * cd               # persistent layer-1 scratch
        interm = tbe * out_p * 4 + tbe * tn * 4
        return w1b + w2b + tiles + hscr + interm

    def shrink(tbe):
        return max(16, _round_up(tbe // 2, 16))

    tn = out_p
    use_resident = resident_vmem(16) <= budget
    if use_resident:
        while resident_vmem(tb_eff) > budget and tb_eff > 16:
            tb_eff = shrink(tb_eff)
    else:
        # Tile out_p: pick the largest column tile (a divisor of out_p that is a
        # multiple of 128) fitting the budget; shrink the batch tile if needed.
        m = out_p // 128
        divisors = [d for d in range(1, m + 1) if m % d == 0]

        def pick_tn(tbe):
            for d in divisors:
                t = out_p // d
                if tiled_vmem(tbe, t) <= budget:
                    return t
            return 128

        tn = pick_tn(tb_eff)
        while tiled_vmem(tb_eff, tn) > budget and tb_eff > 16:
            tb_eff = shrink(tb_eff)
            tn = pick_tn(tb_eff)
        # TODO(synk): if W1 alone still exceeds the budget, add a K grid axis
        # over in_p with an f32 layer-1 accumulator instead of resident W1.

    num_tiles = pl.cdiv(n16, tb_eff)
    n_pad = num_tiles * tb_eff

    # --- activations: aligned fast path skips the pad copy and the out slice
    if in_d == in_p and n_pad == N:
        x_in = x                                   # cast happens in-kernel
    else:
        x_in = jnp.zeros((n_pad, in_p), cdt).at[:N, :in_d].set(x.astype(cdt))

    need = resident_vmem(tb_eff) if use_resident else tiled_vmem(tb_eff, tn)
    vmem_limit = int(min(budget, max(32 * 1024 * 1024, int(1.5 * need))))

    cost = pl.CostEstimate(
        flops=2 * n_pad * in_p * out_p + 2 * n_pad * out_p * out_p,
        transcendentals=0,
        bytes_accessed=int(x_in.size * jnp.dtype(x_in.dtype).itemsize
                           + (w1_p.size + w2_p.size) * cd
                           + (b1_p.size + b2_p.size) * 4
                           + n_pad * out_p * o_bytes),
    )

    def const_spec(shape, index_map):
        if use_buffered:
            return pl.BlockSpec(shape, index_map, pipeline_mode=pl.Buffered(1))
        return pl.BlockSpec(shape, index_map)

    def x_spec(shape, index_map):
        if use_buffered and x_bufs != 2:
            return pl.BlockSpec(shape, index_map, pipeline_mode=pl.Buffered(x_bufs))
        return pl.BlockSpec(shape, index_map)

    if use_resident:
        out_padded = pl.pallas_call(
            _mlp_kernel_resident,
            out_shape=jax.ShapeDtypeStruct((n_pad, out_p), out_dtype),
            grid_spec=pltpu.PrefetchScalarGridSpec(
                num_scalar_prefetch=0,
                grid=(num_tiles,),
                in_specs=[
                    x_spec((tb_eff, x_in.shape[1]), lambda i: (i, 0)),
                    const_spec((in_p, out_p), lambda i: (0, 0)),   # W1 resident
                    const_spec((1, out_p), lambda i: (0, 0)),      # b1
                    const_spec((out_p, out_p), lambda i: (0, 0)),  # W2 resident
                    const_spec((1, out_p), lambda i: (0, 0)),      # b2
                ],
                out_specs=pl.BlockSpec((tb_eff, out_p), lambda i: (i, 0)),
            ),
            compiler_params=pltpu.CompilerParams(
                dimension_semantics=("parallel",),
                vmem_limit_bytes=vmem_limit,
            ),
            cost_estimate=cost,
        )(x_in, w1_p, b1_p, w2_p, b2_p)
    else:
        nj = out_p // tn
        out_padded = pl.pallas_call(
            _mlp_kernel_tiled,
            out_shape=jax.ShapeDtypeStruct((n_pad, out_p), out_dtype),
            grid_spec=pltpu.PrefetchScalarGridSpec(
                num_scalar_prefetch=0,
                grid=(num_tiles, nj),
                in_specs=[
                    pl.BlockSpec((tb_eff, x_in.shape[1]), lambda i, j: (i, 0)),
                    const_spec((in_p, out_p), lambda i, j: (0, 0)),  # W1 resident
                    const_spec((1, out_p), lambda i, j: (0, 0)),     # b1
                    pl.BlockSpec((out_p, tn), lambda i, j: (0, j)),  # W2 col tile
                    pl.BlockSpec((1, tn), lambda i, j: (0, j)),      # b2 col tile
                ],
                out_specs=pl.BlockSpec((tb_eff, tn), lambda i, j: (i, j)),
                scratch_shapes=[pltpu.VMEM((tb_eff, out_p), cdt)],   # layer-1 h
            ),
            compiler_params=pltpu.CompilerParams(
                dimension_semantics=("parallel", "arbitrary"),
                vmem_limit_bytes=vmem_limit,
            ),
            cost_estimate=cost,
        )(x_in, w1_p, b1_p, w2_p, b2_p)

    if out_d == out_p and n_pad == N:
        return out_padded                          # aligned fast path: no slice
    return out_padded[:N, :out_d]


def init_params(key, in_d, out_d, dtype=jnp.float32):
    # nn.Linear default init: U(-1/sqrt(fan_in), 1/sqrt(fan_in)); weight [out, in].
    k1, k2, k3, k4 = jax.random.split(key, 4)
    bound1 = 1.0 / (in_d ** 0.5)
    bound2 = 1.0 / (out_d ** 0.5)
    w1 = jax.random.uniform(k1, (out_d, in_d), dtype, -bound1, bound1)
    b1 = jax.random.uniform(k2, (out_d,), dtype, -bound1, bound1)
    w2 = jax.random.uniform(k3, (out_d, out_d), dtype, -bound2, bound2)
    b2 = jax.random.uniform(k4, (out_d,), dtype, -bound2, bound2)
    return w1, b1, w2, b2


if __name__ == "__main__":
    key = jax.random.PRNGKey(0)
    kx, kp = jax.random.split(key)

    N, in_d, out_d = 16, 32, 64
    x = jax.random.normal(kx, (N, in_d), jnp.float32)
    w1, b1, w2, b2 = init_params(kp, in_d, out_d)

    # Weight prep (transpose/cast/pad) is hoisted: done once, reused per call.
    params = prepare_mlp_params(w1, b1, w2, b2)

    out = mlp_forward(x, params)
    out = jax.block_until_ready(out)

    # Plain-JAX f32 reference of the same math (PyTorch layout: y = x @ W.T + b).
    ref = jnp.maximum(x @ w1.T + b1, 0.0) @ w2.T + b2
    assert out.shape == (N, out_d)
    # bf16 MXU compute with f32 accumulation -> loosened tolerance vs f32 ref.
    assert jnp.allclose(out, ref, atol=2e-2, rtol=2e-2), float(
        jnp.max(jnp.abs(out - ref)))

    print("KERNEL_OK")
</pallas_src>

<mosaic_0001>
module attributes {stable_mosaic.version = 11 : i64} {
  func.func @_copy(%arg0: i32, %arg1: memref<8x128xf32, #tpu.memory_space<vmem>>, %arg2: memref<8x128xf32, #tpu.memory_space<vmem>>) attributes {dimension_semantics = [#tpu.dimension_semantics<arbitrary>], iteration_bounds = array<i64: 1>, scalar_prefetch = 0 : i64, scratch_operands = 0 : i64, tpu.core_type = #tpu.core_type<tc>, window_params = [{pipeline_mode = #tpu.pipeline_mode<synchronous>, transform_indices = @transform_0, window_bounds = array<i64: 8, 128>}, {pipeline_mode = #tpu.pipeline_mode<synchronous>, transform_indices = @transform_1, window_bounds = array<i64: 8, 128>}]} {
    %c0 = arith.constant 0 : index
    %c0_0 = arith.constant 0 : index
    %0 = vector.load %arg1[%c0, %c0_0] : memref<8x128xf32, #tpu.memory_space<vmem>>, vector<8x128xf32>
    %c0_1 = arith.constant 0 : index
    %c0_2 = arith.constant 0 : index
    %1 = vector.load %arg2[%c0_1, %c0_2] : memref<8x128xf32, #tpu.memory_space<vmem>>, vector<8x128xf32>
    tpu.vector_store %arg2[%c0_1, %c0_2], %0 {strides = array<i32>} : memref<8x128xf32, #tpu.memory_space<vmem>>, vector<8x128xf32>,
    return
  }
  func.func @transform_0(%arg0: i32) -> (i32, i32) {
    %c0_i32 = arith.constant 0 : i32
    %c0_i32_0 = arith.constant 0 : i32
    %c0_i32_1 = arith.constant 0 : i32
    return %c0_i32, %c0_i32_0 : i32, i32
  }
  func.func @transform_1(%arg0: i32) -> (i32, i32) {
    %c0_i32 = arith.constant 0 : i32
    %c0_i32_0 = arith.constant 0 : i32
    %c0_i32_1 = arith.constant 0 : i32
    return %c0_i32, %c0_i32_0 : i32, i32
  }
}

module attributes {stable_mosaic.version = 11 : i64} {
  func.func @_mlp_kernel_resident(%arg0: i32, %arg1: memref<16x128xbf16, #tpu.memory_space<vmem>>, %arg2: memref<128x128xbf16, #tpu.memory_space<vmem>>, %arg3: memref<1x128xf32, #tpu.memory_space<vmem>>, %arg4: memref<128x128xbf16, #tpu.memory_space<vmem>>, %arg5: memref<1x128xf32, #tpu.memory_space<vmem>>, %arg6: memref<16x128xf32, #tpu.memory_space<vmem>>) attributes {dimension_semantics = [#tpu.dimension_semantics<parallel>], iteration_bounds = array<i64: 1>, scalar_prefetch = 0 : i64, scratch_operands = 0 : i64, tpu.core_type = #tpu.core_type<tc>, window_params = [{transform_indices = @transform_0, window_bounds = array<i64: 16, 128>}, {pipeline_mode = #tpu.pipeline_mode<synchronous>, transform_indices = @transform_1, window_bounds = array<i64: 128, 128>}, {pipeline_mode = #tpu.pipeline_mode<synchronous>, transform_indices = @transform_2, window_bounds = array<i64: 1, 128>}, {pipeline_mode = #tpu.pipeline_mode<synchronous>, transform_indices = @transform_3, window_bounds = array<i64: 128, 128>}, {pipeline_mode = #tpu.pipeline_mode<synchronous>, transform_indices = @transform_4, window_bounds = array<i64: 1, 128>}, {transform_indices = @transform_5, window_bounds = array<i64: 16, 128>}]} {
    %c0 = arith.constant 0 : index
    %c0_0 = arith.constant 0 : index
    %0 = vector.load %arg1[%c0, %c0_0] : memref<16x128xbf16, #tpu.memory_space<vmem>>, vector<16x128xbf16>
    %c0_1 = arith.constant 0 : index
    %c0_2 = arith.constant 0 : index
    %1 = vector.load %arg2[%c0_1, %c0_2] : memref<128x128xbf16, #tpu.memory_space<vmem>>, vector<128x128xbf16>
    %cst = arith.constant dense<0.000000e+00> : vector<16x128xf32>
    %2 = tpu.matmul %0, %1, %cst {dimension_numbers = #tpu.dot_dimension_numbers<[1], [0], [0], [1], [0, 0, 1, 1], [], []>} : vector<16x128xbf16>, vector<128x128xbf16>, vector<16x128xf32> -> vector<16x128xf32>
    %c0_3 = arith.constant 0 : index
    %c0_4 = arith.constant 0 : index
    %3 = vector.load %arg3[%c0_3, %c0_4] : memref<1x128xf32, #tpu.memory_space<vmem>>, vector<1x128xf32>
    %4 = vector.broadcast %3 : vector<1x128xf32> to vector<16x128xf32>
    %5 = arith.addf %2, %4 : vector<16x128xf32>
    %cst_5 = arith.constant 0.000000e+00 : f32
    %6 = vector.broadcast %cst_5 : f32 to vector<16x128xf32>
    %7 = arith.maximumf %5, %6 : vector<16x128xf32>
    %8 = arith.truncf %7 : vector<16x128xf32> to vector<16x128xbf16>
    %c0_6 = arith.constant 0 : index
    %c0_7 = arith.constant 0 : index
    %9 = vector.load %arg4[%c0_6, %c0_7] : memref<128x128xbf16, #tpu.memory_space<vmem>>, vector<128x128xbf16>
    %cst_8 = arith.constant dense<0.000000e+00> : vector<16x128xf32>
    %10 = tpu.matmul %8, %9, %cst_8 {dimension_numbers = #tpu.dot_dimension_numbers<[1], [0], [0], [1], [0, 0, 1, 1], [], []>} : vector<16x128xbf16>, vector<128x128xbf16>, vector<16x128xf32> -> vector<16x128xf32>
    %c0_9 = arith.constant 0 : index
    %c0_10 = arith.constant 0 : index
    %11 = vector.load %arg5[%c0_9, %c0_10] : memref<1x128xf32, #tpu.memory_space<vmem>>, vector<1x128xf32>
    %12 = vector.broadcast %11 : vector<1x128xf32> to vector<16x128xf32>
    %13 = arith.addf %10, %12 : vector<16x128xf32>
    %c0_11 = arith.constant 0 : index
    %c0_12 = arith.constant 0 : index
    %14 = vector.load %arg6[%c0_11, %c0_12] : memref<16x128xf32, #tpu.memory_space<vmem>>, vector<16x128xf32>
    tpu.vector_store %arg6[%c0_11, %c0_12], %13 {strides = array<i32>} : memref<16x128xf32, #tpu.memory_space<vmem>>, vector<16x128xf32>,
    return
  }
  func.func @transform_0(%arg0: i32) -> (i32, i32) {
    %c0_i32 = arith.constant 0 : i32
    %c0_i32_0 = arith.constant 0 : i32
    return %arg0, %c0_i32 : i32, i32
  }
  func.func @transform_1(%arg0: i32) -> (i32, i32) {
    %c0_i32 = arith.constant 0 : i32
    %c0_i32_0 = arith.constant 0 : i32
    %c0_i32_1 = arith.constant 0 : i32
    return %c0_i32, %c0_i32_0 : i32, i32
  }
  func.func @transform_2(%arg0: i32) -> (i32, i32) {
    %c0_i32 = arith.constant 0 : i32
    %c0_i32_0 = arith.constant 0 : i32
    %c0_i32_1 = arith.constant 0 : i32
    return %c0_i32, %c0_i32_0 : i32, i32
  }
  func.func @transform_3(%arg0: i32) -> (i32, i32) {
    %c0_i32 = arith.constant 0 : i32
    %c0_i32_0 = arith.constant 0 : i32
    %c0_i32_1 = arith.constant 0 : i32
    return %c0_i32, %c0_i32_0 : i32, i32
  }
  func.func @transform_4(%arg0: i32) -> (i32, i32) {
    %c0_i32 = arith.constant 0 : i32
    %c0_i32_0 = arith.constant 0 : i32
    %c0_i32_1 = arith.constant 0 : i32
    return %c0_i32, %c0_i32_0 : i32, i32
  }
  func.func @transform_5(%arg0: i32) -> (i32, i32) {
    %c0_i32 = arith.constant 0 : i32
    %c0_i32_0 = arith.constant 0 : i32
    return %arg0, %c0_i32 : i32, i32
  }
}

</mosaic_0001>

<bundles_post_ra>
// kernel: tpu_custom_call.1
= control target key start
LH: loop header
LB: loop body
LE: loop exit
PB: predicated region body
PF: predicated region fallthrough
CT: control target
= control target key end

     0   :  { %6 = vsyncpa [#allocation3], 0  ;;  %s124_s0 = inlined_call_operand.hbm [shape: f32[8,128], index: 0, kind: input, shape index: {}]   ;;  %s125_s1 = inlined_call_operand.hbm [shape: f32[8,128], index: 1, kind: output, shape index: {}]  }
   0x1   :  { %7 = vsyncpa [#allocation4], 0  ;;  %s88_s6 = smov [#allocation2]   ;;  %s40_s10 = scalar_lea.hbm %s124_s0, 128 }
   0x2   :  { %s14_s7 = sshll.u32 %s88_s6, 4  ;;  %p41_p0 = scmp.ne.s32.totalorder %s124_s0, %s40_s10  ;;  %s15_s7 = int_to_ptr.vmem [resolvable:$true] %s14_s7 }
   0x3   :  { %p44_p1 = scmp.lt.u32.totalorder %s40_s10, %s124_s0 }
   0x5   :  { %p46_p2 = pnand %p44_p1, %p41_p0 }
   0x7   :  { %49 = shalt.err (!%p46_p2)
}
   0x8   :  { %s50_s15 = scalar_lea.vmem %s15_s7, 128  ;;  %p55_p4 = scmp.lt.s32.totalorder %s15_s7, %s15_s7 }
   0x9   :  { %p51_p3 = scmp.ne.s32.totalorder %s15_s7, %s50_s15  ;;  %p56_p5 = scmp.lt.s32.totalorder %s50_s15, %s50_s15 }
   0xb   :  { %p57_p6 = por %p56_p5, %p55_p4 }
   0xd   :  { %p58_p7 = pnand %p57_p6, %p51_p3 }
   0xf   :  { %61 = shalt.err (!%p58_p7)
}
  0x10   :  { %17 = dma.hbm_to_vmem [thread:$0]  %s124_s0, 128, %s15_s7, [#allocation3]  }
  0x11   :  { %84 = dma.done.wait [#allocation3], 128  }
  0x12   :  { %85 = vsyncadd [#allocation3], 4294967168  ;;  %s89_s18 = smov [#allocation5]   ;;  %v21_v0 = vld [vmem:[#allocation2] sm:$0xff] }
  0x13   :  { %s29_s19 = sshll.u32 %s89_s18, 4  ;;  %22 = vst [vmem:[#allocation5] sm:$0xff] %v21_v0  ;;  %s30_s19 = int_to_ptr.vmem [resolvable:$true] %s29_s19 }
  0x14   :  { %s62_s20 = scalar_lea.vmem %s30_s19, 128  ;;  %p67_p9 = scmp.lt.s32.totalorder %s30_s19, %s30_s19 }
  0x15   :  { %p63_p8 = scmp.ne.s32.totalorder %s30_s19, %s62_s20  ;;  %p68_p10 = scmp.lt.s32.totalorder %s62_s20, %s62_s20 }
  0x17   :  { %p69_p11 = por %p68_p10, %p67_p9 }
  0x19   :  { %p70_p12 = pnand %p69_p11, %p63_p8 }
  0x1b   :  { %73 = shalt.err (!%p70_p12)
}
  0x1c   :  { %s74_s23 = scalar_lea.hbm %s125_s1, 128 }
  0x1d   :  { %p75_p13 = scmp.ne.s32.totalorder %s125_s1, %s74_s23  ;;  %p78_p0 = scmp.lt.u32.totalorder %s74_s23, %s125_s1 }
  0x1f   :  { %p80_p1 = pnand %p78_p0, %p75_p13 }
  0x21   :  { %83 = shalt.err (!%p80_p1)
}
  0x22   :  { %32 = dma.vmem_to_hbm [thread:$0]  %s30_s19, 128, %s125_s1, [#allocation4]  }
  0x23   :  { %86 = dma.done.wait [#allocation4], 128  }
  0x24   :  { %87 = vsyncadd [#allocation4], 4294967168 }
  0x25   :  { %36 = vsyncpa [#allocation3], 1 }
  0x26   :  { %37 = vsyncpa [#allocation4], 1 }

// kernel: tpu_custom_call.1
= control target key start
LH: loop header
LB: loop body
LE: loop exit
PB: predicated region body
PF: predicated region fallthrough
CT: control target
= control target key end

     0   :  { %10 = vsyncpa [#allocation3], 0  ;;  %s626_s0 = inlined_call_operand.hbm [shape: bf16[16,128], index: 0, kind: input, shape index: {}]   ;;  %s627_s1 = inlined_call_operand.hbm [shape: bf16[128,128], index: 1, kind: input, shape index: {}]   ;;  %s628_s2 = inlined_call_operand.vmem [shape: f32[1,128], index: 2, kind: input, shape index: {}]   ;;  %s629_s3 = inlined_call_operand.hbm [shape: bf16[128,128], index: 3, kind: input, shape index: {}]   ;;  %s630_s4 = inlined_call_operand.vmem [shape: f32[1,128], index: 4, kind: input, shape index: {}]   ;;  %s631_s5 = inlined_call_operand.hbm [shape: f32[16,128], index: 5, kind: output, shape index: {}]  }
   0x1   :  { %11 = vsyncpa [#allocation6], 0 }
   0x2   :  { %12 = vsyncpa [#allocation4], 0  ;;  %s516_s18 = smov [#allocation5]   ;;  %s517_s20 = smov [#allocation2]  }
   0x3   :  { %s30_s19 = sshll.u32 %s516_s18, 4  ;;  %s18_s21 = sshll.u32 %s517_s20, 4  ;;  %s31_s19 = int_to_ptr.vmem [resolvable:$true] %s30_s19  ;;  %s556_s21 = int_to_ptr.vmem [resolvable:$true] %s18_s21 }
   0x4   :  { %s422_s24 = scalar_lea.hbm %s627_s1, 1024 }
   0x5   :  { %p423_p0 = scmp.ne.s32.totalorder %s627_s1, %s422_s24  ;;  %p426_p1 = scmp.lt.u32.totalorder %s422_s24, %s627_s1 }
   0x7   :  { %p428_p2 = pnand %p426_p1, %p423_p0 }
   0x9   :  { %431 = shalt.err (!%p428_p2)
}
   0xa   :  { %s432_s29 = scalar_lea.vmem %s31_s19, 1024  ;;  %p437_p4 = scmp.lt.s32.totalorder %s31_s19, %s31_s19 }
   0xb   :  { %p433_p3 = scmp.ne.s32.totalorder %s31_s19, %s432_s29  ;;  %p438_p5 = scmp.lt.s32.totalorder %s432_s29, %s432_s29 }
   0xd   :  { %p439_p6 = por %p438_p5, %p437_p4 }
   0xf   :  { %p440_p7 = pnand %p439_p6, %p433_p3 }
  0x11   :  { %443 = shalt.err (!%p440_p7)
}
  0x12   :  { %s518_s30 = smov 64   ;;  %s519_s6 = smov 4  }
  0x13   :  { %36 = dma.hbm_to_vmem [thread:$0]  %s627_s1, 1024, %s31_s19, [#allocation6], %s518_s30, %s518_s30, %s519_s6  }
  0x14   :  { %s444_s11 = scalar_lea.hbm %s626_s0, 128 }
  0x15   :  { %p445_p8 = scmp.ne.s32.totalorder %s626_s0, %s444_s11  ;;  %p448_p9 = scmp.lt.u32.totalorder %s444_s11, %s626_s0 }
  0x17   :  { %p450_p10 = pnand %p448_p9, %p445_p8 }
  0x19   :  { %453 = shalt.err (!%p450_p10)
}
  0x1a   :  { %s454_s16 = scalar_lea.vmem %s556_s21, 128  ;;  %p459_p12 = scmp.lt.s32.totalorder %s556_s21, %s556_s21 }
  0x1b   :  { %p455_p11 = scmp.ne.s32.totalorder %s556_s21, %s454_s16  ;;  %p460_p13 = scmp.lt.s32.totalorder %s454_s16, %s454_s16 }
  0x1d   :  { %p461_p0 = por %p460_p13, %p459_p12 }
  0x1f   :  { %p462_p1 = pnand %p461_p0, %p455_p11 }
  0x21   :  { %465 = shalt.err (!%p462_p1)
}
  0x22   :  { %24 = dma.hbm_to_vmem [thread:$0]  %s626_s0, 128, %s556_s21, [#allocation3], %s518_s30, %s518_s30, %s519_s6  }
  0x23   :  { %s520_s18 = smov [#allocation7]   ;;  %s466_s23 = scalar_lea.hbm %s629_s3, 1024 }
  0x24   :  { %s44_s19 = sshll.u32 %s520_s18, 4  ;;  %p467_p2 = scmp.ne.s32.totalorder %s629_s3, %s466_s23  ;;  %s45_s19 = int_to_ptr.vmem [resolvable:$true] %s44_s19 }
  0x25   :  { %p470_p3 = scmp.lt.u32.totalorder %s466_s23, %s629_s3 }
  0x27   :  { %p472_p4 = pnand %p470_p3, %p467_p2 }
  0x29   :  { %475 = shalt.err (!%p472_p4)
}
  0x2a   :  { %s476_s28 = scalar_lea.vmem %s45_s19, 1024  ;;  %p481_p6 = scmp.lt.s32.totalorder %s45_s19, %s45_s19 }
  0x2b   :  { %p477_p5 = scmp.ne.s32.totalorder %s45_s19, %s476_s28  ;;  %p482_p7 = scmp.lt.s32.totalorder %s476_s28, %s476_s28 }
  0x2d   :  { %p483_p8 = por %p482_p7, %p481_p6 }
  0x2f   :  { %p484_p9 = pnand %p483_p8, %p477_p5 }
  0x31   :  { %487 = shalt.err (!%p484_p9)
}
  0x32   :  { %50 = dma.hbm_to_vmem [thread:$0]  %s629_s3, 1024, %s45_s19, [#allocation6], %s518_s30, %s518_s30, %s519_s6  }
  0x33   :  { %510 = dma.done.wait [#allocation3], 128  }
  0x34   :  { %511 = vsyncadd [#allocation3], 4294967168 }
  0x35   :  { %512 = dma.done.wait [#allocation6], 2048  }
  0x36   :  { %513 = vsyncadd [#allocation6], 4294965248  ;;  %v521_v0 = vmov 0.0   ;;  %vm522_vm0 = vmmov 0   ;;  %v405_v1 = vld [vmem:[#allocation5] sm:$0xff]   ;;  %v406_v2 = vld [vmem:[#allocation5 + $0x8] sm:$0xff]  }
  0x37   :  { %355 = vmatprep.subr.bf16.mxu0 %v521_v0  ;;  %371 = vmatprep.mubr.msk.bf16.mxu0 %vm522_vm0, %v521_v0  ;;  %v407_v3 = vld [vmem:[#allocation5 + $0x10] sm:$0xff]   ;;  %v414_v4 = vld [vmem:[#allocation7] sm:$0xff]   ;;  %v408_v5 = vld [vmem:[#allocation5 + $0x18] sm:$0xff]   ;;  %s523_s7 = smov [#allocation8]  }
  0x38   :  { %375 = vmatprep.subr.bf16.mxu1 %v521_v0  ;;  %391 = vmatprep.mubr.msk.bf16.mxu1 %vm522_vm0, %v521_v0  ;;  %v415_v6 = vld [vmem:[#allocation7 + $0x8] sm:$0xff]   ;;  %v409_v7 = vld [vmem:[#allocation5 + $0x20] sm:$0xff]   ;;  %v416_v8 = vld [vmem:[#allocation7 + $0x10] sm:$0xff]   ;;  %s305_s8 = sshll.u32 %s523_s7, 4  ;;  %s306_s8 = int_to_ptr.vmem [resolvable:$true] %s305_s8 }
  0x39   :  { %356 = vmatpush3.bf16.msra.mxu0 %v405_v1  ;;  %376 = vmatpush3.bf16.msra.mxu1 %v414_v4  ;;  %v410_v9 = vld [vmem:[#allocation5 + $0x28] sm:$0xff]   ;;  %v417_v10 = vld [vmem:[#allocation7 + $0x18] sm:$0xff]   ;;  %v411_v11 = vld [vmem:[#allocation5 + $0x30] sm:$0xff]   ;;  %p493_p11 = scmp.lt.s32.totalorder %s306_s8, %s306_s8 }
  0x3a   :  { %357 = vmatprep.subr.bf16.mxu0 %v521_v0  ;;  %377 = vmatprep.subr.bf16.mxu1 %v521_v0  ;;  %v418_v12 = vld [vmem:[#allocation7 + $0x20] sm:$0xff]   ;;  %v412_v13 = vld [vmem:[#allocation5 + $0x38] sm:$0xff]   ;;  %v419_v14 = vld [vmem:[#allocation7 + $0x28] sm:$0xff]  }
  0x3b   :  { %v413_v15 = vld [vmem:[#allocation2] sm:$0xff]   ;;  %v420_v16 = vld [vmem:[#allocation7 + $0x30] sm:$0xff]  }
  0x3c   :  { %v421_v17 = vld [vmem:[#allocation7 + $0x38] sm:$0xff]  }
  0x3d   :  { %358 = vmatpush3.bf16.msra.mxu0 %v406_v2  ;;  %378 = vmatpush3.bf16.msra.mxu1 %v415_v6  ;;  %v318_v18 = vld [vmem:[%s628_s2] ss:$0 sm:$0xff]  ;;  %s488_s2 = scalar_lea.vmem %s306_s8, 256 }
  0x3e   :  { %359 = vmatprep.subr.bf16.mxu0 %v521_v0  ;;  %379 = vmatprep.subr.bf16.mxu1 %v521_v0  ;;  %v328_v28 = vld [vmem:[%s630_s4] ss:$0 sm:$0xff]  ;;  %p489_p10 = scmp.ne.s32.totalorder %s306_s8, %s488_s2  ;;  %p494_p12 = scmp.lt.s32.totalorder %s488_s2, %s488_s2 }
  0x40   :  { %p495_p13 = por %p494_p12, %p493_p11 }
  0x41   :  { %360 = vmatpush3.bf16.msra.mxu0 %v407_v3  ;;  %380 = vmatpush3.bf16.msra.mxu1 %v416_v8 }
  0x42   :  { %361 = vmatprep.subr.bf16.mxu0 %v521_v0  ;;  %381 = vmatprep.subr.bf16.mxu1 %v521_v0  ;;  %p496_p0 = pnand %p495_p13, %p489_p10 }
  0x45   :  { %362 = vmatpush3.bf16.msra.mxu0 %v408_v5  ;;  %382 = vmatpush3.bf16.msra.mxu1 %v417_v10 }
  0x46   :  { %363 = vmatprep.subr.bf16.mxu0 %v521_v0  ;;  %383 = vmatprep.subr.bf16.mxu1 %v521_v0 }
  0x49   :  { %364 = vmatpush3.bf16.msra.mxu0 %v409_v7  ;;  %384 = vmatpush3.bf16.msra.mxu1 %v418_v12 }
  0x4a   :  { %365 = vmatprep.subr.bf16.mxu0 %v521_v0  ;;  %385 = vmatprep.subr.bf16.mxu1 %v521_v0 }
  0x4d   :  { %366 = vmatpush3.bf16.msra.mxu0 %v410_v9  ;;  %386 = vmatpush3.bf16.msra.mxu1 %v419_v14 }
  0x4e   :  { %367 = vmatprep.subr.bf16.mxu0 %v521_v0  ;;  %387 = vmatprep.subr.bf16.mxu1 %v521_v0 }
  0x51   :  { %368 = vmatpush3.bf16.msra.mxu0 %v411_v11  ;;  %388 = vmatpush3.bf16.msra.mxu1 %v420_v16 }
  0x52   :  { %369 = vmatprep.subr.bf16.mxu0 %v521_v0  ;;  %389 = vmatprep.subr.bf16.mxu1 %v521_v0 }
  0x55   :  { %370 = vmatpush3.bf16.msra.mxu0 %v412_v13  ;;  %390 = vmatpush3.bf16.msra.mxu1 %v421_v17 }
  0x58   :  { %372 = vmatmul.mubr.bf16.vlgmr.msra.gmra.mrb[0].mxu0 %v413_v15 }
 0x12b   :  { %v176_v19 = vpop.f32.mrb[0].mxu0 }
 0x12c   :  { %v177_v20 = vadd.f32 %v318_v18, %v176_v19  ;;  %v373_v21 = vpop.f32.mrb[1].mxu0 }
 0x12d   :  { %v179_v22 = vpop.f32.mrb[2].mxu0 }
 0x12e   :  { %v180_v23 = vadd.f32 %v318_v18, %v179_v22  ;;  %v374_v24 = vpop.f32.mrb[3].mxu0  ;;  %v183_v25 = vmax.f32 %v177_v20, 0.0 }
 0x130   :  { %v184_v26 = vmax.f32 %v180_v23, 0.0 }
 0x132   :  { %v185_v27 = vpack.c.bf16 %v184_v26, %v183_v25 }
 0x134   :  { %392 = vmatmul.mubr.bf16.vlgmr.msra.gmra.mrb[0].mxu1 %v185_v27 }
 0x207   :  { %v291_v29 = vpop.f32.mrb[0].mxu1 }
 0x208   :  { %v292_v30 = vadd.f32 %v328_v28, %v291_v29  ;;  %v393_v31 = vpop.f32.mrb[1].mxu1 }
 0x209   :  { %v294_v32 = vpop.f32.mrb[2].mxu1 }
 0x20a   :  { %298 = vst [vmem:[#allocation8] sm:$0xff] %v292_v30  ;;  %v295_v33 = vadd.f32 %v328_v28, %v294_v32  ;;  %v394_v34 = vpop.f32.mrb[3].mxu1 }
 0x20c   :  { %299 = vst [vmem:[#allocation8 + $0x8] sm:$0xff] %v295_v33 }
 0x20d   :  { %499 = shalt.err (!%p496_p0)
}
 0x20e   :  { %s500_s10 = scalar_lea.hbm %s631_s5, 256 }
 0x20f   :  { %p501_p1 = scmp.ne.s32.totalorder %s631_s5, %s500_s10  ;;  %p504_p2 = scmp.lt.u32.totalorder %s500_s10, %s631_s5 }
 0x211   :  { %p506_p3 = pnand %p504_p2, %p501_p1 }
 0x213   :  { %509 = shalt.err (!%p506_p3)
}
 0x214   :  { %s524_s15 = smov 128   ;;  %s525_s16 = smov 8  }
 0x215   :  { %311 = dma.vmem_to_hbm [thread:$0]  %s306_s8, 256, %s631_s5, [#allocation4], %s524_s15, %s524_s15, %s525_s16  }
 0x216   :  { %514 = dma.done.wait [#allocation4], 256  }
 0x217   :  { %515 = vsyncadd [#allocation4], 4294967040 }
 0x218   :  { %315 = vsyncpa [#allocation3], 1 }
 0x219   :  { %316 = vsyncpa [#allocation6], 1 }
 0x21a   :  { %317 = vsyncpa [#allocation4], 1 }

</bundles_post_ra>
